<compile_context>
chip_gen: v7x
topology: tpu7x:2x2x1
jax: 0.10.0
libtpu: 0.0.40
codegen_flags: <defaults>
</compile_context>

<pallas_src>
import functools

import jax
import jax.numpy as jnp
from jax.experimental import pallas as pl
from jax.experimental.pallas import tpu as pltpu

_LANE = 128
_SUBLANE = 8
_TILE_ROWS = 1024  # 1024 x 128 f32 = 512 KiB per tile; fits every TPU gen.


# ---------------------------------------------------------------------------
# Kernels
# ---------------------------------------------------------------------------
def _add_kernel(u_ref, v_ref, o_ref):
    """o = u + v  (one lane-dense tile per grid step)."""
    o_ref[...] = u_ref[...] + v_ref[...]


def _add_const_kernel(u_ref, o_ref, *, v_init):
    """o = u + v_init  (v is None case: broadcast scalar initial potential)."""
    o_ref[...] = u_ref[...] + jnp.asarray(v_init, dtype=o_ref.dtype)


def _accumulate_seq_kernel(u_ref, o_ref, acc_ref, *, v_init):
    """Fused T-step accumulation; membrane potential resident in VMEM scratch."""
    t = pl.program_id(1)

    @pl.when(t == 0)
    def _():
        acc_ref[...] = jnp.full(acc_ref.shape, v_init, dtype=acc_ref.dtype)

    acc_ref[...] += u_ref[...].astype(acc_ref.dtype)

    @pl.when(t == pl.num_programs(1) - 1)
    def _():
        o_ref[...] = acc_ref[...].astype(o_ref.dtype)


# ---------------------------------------------------------------------------
# Layout helpers
# ---------------------------------------------------------------------------
def _to_lane_dense(x):
    """Flatten to (rows, 128) with rows % 8 == 0 (pad the tail with zeros)."""
    n = x.size
    chunk = _LANE * _SUBLANE
    n_pad = -(-n // chunk) * chunk
    flat = x.reshape(-1)
    if n_pad != n:
        flat = jnp.pad(flat, (0, n_pad - n))
    return flat.reshape(n_pad // _LANE, _LANE)


# ---------------------------------------------------------------------------
# Single-step Accumulate (same semantics as the PyTorch forward)
# ---------------------------------------------------------------------------
def accumulate(u_in, v=None, *, v_init=0.0, tile_rows=_TILE_ROWS):
    """Pallas equivalent of Accumulate(v_init).forward(u_in, v)."""
    # Adding a constant zero everywhere is a no-op: skip the kernel launch.
    if v is None and isinstance(v_init, (int, float)) and v_init == 0.0:
        return u_in

    orig_shape = u_in.shape
    n = u_in.size
    u2d = _to_lane_dense(u_in)
    rows = u2d.shape[0]

    tr = min(tile_rows, rows)              # rows is always a multiple of 8
    grid = (pl.cdiv(rows, tr),)
    spec = pl.BlockSpec((tr, _LANE), lambda i: (i, 0))
    out_shape = jax.ShapeDtypeStruct((rows, _LANE), u_in.dtype)
    cparams = pltpu.CompilerParams(dimension_semantics=("parallel",))

    if v is None:
        out2d = pl.pallas_call(
            functools.partial(_add_const_kernel, v_init=v_init),
            out_shape=out_shape,
            grid=grid,
            in_specs=[spec],
            out_specs=spec,
            compiler_params=cparams,
        )(u2d)
    else:
        # Match PyTorch result dtype by casting v to u_in's dtype up front.
        v2d = _to_lane_dense(v.astype(u_in.dtype))
        # TODO(synk): if the caller treats the update as in-place on v, add
        # input_output_aliases={1: 0}; PyTorch semantics are out-of-place so
        # we keep v untouched here.
        out2d = pl.pallas_call(
            _add_kernel,
            out_shape=out_shape,
            grid=grid,
            in_specs=[spec, spec],
            out_specs=spec,
            compiler_params=cparams,
        )(u2d, v2d)

    return out2d.reshape(-1)[:n].reshape(orig_shape)


# ---------------------------------------------------------------------------
# Fused SNN time loop: one kernel launch for T Accumulate steps
#   v_T = v_init + sum_t u_seq[t]   (== repeatedly applying Accumulate)
# ---------------------------------------------------------------------------
def accumulate_sequence(u_seq, *, v_init=0.0, tile_rows=_TILE_ROWS):
    T = u_seq.shape[0]
    step_shape = u_seq.shape[1:]
    n = 1
    for d in step_shape:
        n *= d

    chunk = _LANE * _SUBLANE
    n_pad = -(-n // chunk) * chunk
    flat = u_seq.reshape(T, -1)
    if n_pad != n:
        flat = jnp.pad(flat, ((0, 0), (0, n_pad - n)))
    rows = n_pad // _LANE
    u3d = flat.reshape(T, rows, _LANE)

    tr = min(tile_rows, rows)
    # Row tiles outer (parallel, megacore-shardable); time axis inner
    # (arbitrary) so the output/accumulator block stays resident across T.
    grid = (pl.cdiv(rows, tr), T)

    out2d = pl.pallas_call(
        functools.partial(_accumulate_seq_kernel, v_init=v_init),
        out_shape=jax.ShapeDtypeStruct((rows, _LANE), u_seq.dtype),
        grid=grid,
        in_specs=[pl.BlockSpec((None, tr, _LANE), lambda i, t: (t, i, 0))],
        out_specs=pl.BlockSpec((tr, _LANE), lambda i, t: (i, 0)),
        scratch_shapes=[pltpu.VMEM((tr, _LANE), jnp.float32)],
        compiler_params=pltpu.CompilerParams(
            dimension_semantics=("parallel", "arbitrary")),
    )(u3d)

    return out2d.reshape(-1)[:n].reshape(step_shape)


# ---------------------------------------------------------------------------
# Demo / self-test
# ---------------------------------------------------------------------------
if __name__ == "__main__":
    key = jax.random.PRNGKey(0)
    k_u, k_v, k_s, k_o = jax.random.split(key, 4)

    # Small NCHW-like input consistent with typical SNN membrane potentials.
    u_in = jax.random.normal(k_u, (2, 4, 16, 16), dtype=jnp.float32)
    v_in = jax.random.normal(k_v, (2, 4, 16, 16), dtype=jnp.float32)
    v_init = 0.5

    # Case 1: v is None -> v = full_like(u_in, v_init)
    out_none = accumulate(u_in, None, v_init=v_init)
    jax.block_until_ready(out_none)
    assert out_none.shape == u_in.shape and out_none.dtype == u_in.dtype
    assert jnp.allclose(out_none, u_in + jnp.full_like(u_in, v_init), atol=1e-6)

    # Case 1b: v is None, v_init == 0 -> short-circuit (no kernel launch)
    out_zero = accumulate(u_in, None, v_init=0.0)
    assert jnp.allclose(out_zero, u_in)

    # Case 2: explicit v
    out_v = accumulate(u_in, v_in, v_init=v_init)
    jax.block_until_ready(out_v)
    assert jnp.allclose(out_v, u_in + v_in, atol=1e-6)

    # Case 3: odd size that exercises the lane-dense padding path
    u_odd = jax.random.normal(k_o, (3, 5, 7), dtype=jnp.float32)  # 105 elems
    out_odd = accumulate(u_odd, None, v_init=v_init)
    jax.block_until_ready(out_odd)
    assert jnp.allclose(out_odd, u_odd + v_init, atol=1e-6)

    # Case 4: fused T-step time loop (one launch, VMEM-resident accumulator)
    T = 8
    u_seq = jax.random.normal(k_s, (T, 2, 4, 16, 16), dtype=jnp.float32)
    out_seq = accumulate_sequence(u_seq, v_init=v_init)
    jax.block_until_ready(out_seq)
    ref_seq = jnp.full(u_seq.shape[1:], v_init, dtype=u_seq.dtype)
    for t in range(T):
        ref_seq = u_seq[t] + ref_seq
    assert jnp.allclose(out_seq, ref_seq, atol=1e-5)

    print("KERNEL_OK")
</pallas_src>

<mosaic_0001>
module attributes {stable_mosaic.version = 11 : i64} {
  func.func @_add_const_kernel(%arg0: i32, %arg1: memref<16x128xf32, #tpu.memory_space<vmem>>, %arg2: memref<16x128xf32, #tpu.memory_space<vmem>>) attributes {dimension_semantics = [#tpu.dimension_semantics<parallel>], iteration_bounds = array<i64: 1>, scalar_prefetch = 0 : i64, scratch_operands = 0 : i64, tpu.core_type = #tpu.core_type<tc>, window_params = [{transform_indices = @transform_0, window_bounds = array<i64: 16, 128>}, {transform_indices = @transform_1, window_bounds = array<i64: 16, 128>}]} {
    %c0 = arith.constant 0 : index
    %c0_0 = arith.constant 0 : index
    %0 = vector.load %arg1[%c0, %c0_0] : memref<16x128xf32, #tpu.memory_space<vmem>>, vector<16x128xf32>
    %cst = arith.constant 5.000000e-01 : f32
    %1 = vector.broadcast %cst : f32 to vector<16x128xf32>
    %2 = arith.addf %0, %1 : vector<16x128xf32>
    %c0_1 = arith.constant 0 : index
    %c0_2 = arith.constant 0 : index
    %3 = vector.load %arg2[%c0_1, %c0_2] : memref<16x128xf32, #tpu.memory_space<vmem>>, vector<16x128xf32>
    tpu.vector_store %arg2[%c0_1, %c0_2], %2 {strides = array<i32>} : memref<16x128xf32, #tpu.memory_space<vmem>>, vector<16x128xf32>,
    return
  }
  func.func @transform_0(%arg0: i32) -> (i32, i32) {
    %c0_i32 = arith.constant 0 : i32
    %c0_i32_0 = arith.constant 0 : i32
    return %arg0, %c0_i32 : i32, i32
  }
  func.func @transform_1(%arg0: i32) -> (i32, i32) {
    %c0_i32 = arith.constant 0 : i32
    %c0_i32_0 = arith.constant 0 : i32
    return %arg0, %c0_i32 : i32, i32
  }
}

</mosaic_0001>

<bundles_post_ra>
// kernel: tpu_custom_call.1
= control target key start
LH: loop header
LB: loop body
LE: loop exit
PB: predicated region body
PF: predicated region fallthrough
CT: control target
= control target key end

     0   :  { %6 = vsyncpa [#allocation3], 0  ;;  %s136_s0 = inlined_call_operand.hbm [shape: f32[16,128], index: 0, kind: input, shape index: {}]   ;;  %s137_s1 = inlined_call_operand.hbm [shape: f32[16,128], index: 1, kind: output, shape index: {}]  }
   0x1   :  { %7 = vsyncpa [#allocation4], 0  ;;  %s98_s6 = smov [#allocation2]   ;;  %s50_s10 = scalar_lea.hbm %s136_s0, 256 }
   0x2   :  { %s13_s7 = sshll.u32 %s98_s6, 4  ;;  %p51_p0 = scmp.ne.s32.totalorder %s136_s0, %s50_s10  ;;  %s14_s7 = int_to_ptr.vmem [resolvable:$true] %s13_s7 }
   0x3   :  { %p54_p1 = scmp.lt.u32.totalorder %s50_s10, %s136_s0 }
   0x5   :  { %p56_p2 = pnand %p54_p1, %p51_p0 }
   0x7   :  { %59 = shalt.err (!%p56_p2)
}
   0x8   :  { %s60_s15 = scalar_lea.vmem %s14_s7, 256  ;;  %p65_p4 = scmp.lt.s32.totalorder %s14_s7, %s14_s7 }
   0x9   :  { %p61_p3 = scmp.ne.s32.totalorder %s14_s7, %s60_s15  ;;  %p66_p5 = scmp.lt.s32.totalorder %s60_s15, %s60_s15 }
   0xb   :  { %p67_p6 = por %p66_p5, %p65_p4 }
   0xd   :  { %p68_p7 = pnand %p67_p6, %p61_p3 }
   0xf   :  { %71 = shalt.err (!%p68_p7)
}
  0x10   :  { %s99_s16 = smov 128   ;;  %s100_s17 = smov 8  }
  0x11   :  { %19 = dma.hbm_to_vmem [thread:$0]  %s136_s0, 256, %s14_s7, [#allocation3], %s99_s16, %s99_s16, %s100_s17  }
  0x12   :  { %94 = dma.done.wait [#allocation3], 256  }
  0x13   :  { %95 = vsyncadd [#allocation3], 4294967040  ;;  %s101_s20 = smov [#allocation5]   ;;  %v23_v0 = vld [vmem:[#allocation2] sm:$0xff]  ;;  %v24_v1 = vld [vmem:[#allocation2 + $0x8] sm:$0xff] }
  0x14   :  { %s34_s21 = sshll.u32 %s101_s20, 4  ;;  %v25_v2 = vadd.f32 0.5, %v23_v0  ;;  %v26_v3 = vadd.f32 0.5, %v24_v1  ;;  %s35_s21 = int_to_ptr.vmem [resolvable:$true] %s34_s21 }
  0x15   :  { %s72_s22 = scalar_lea.vmem %s35_s21, 256  ;;  %p77_p9 = scmp.lt.s32.totalorder %s35_s21, %s35_s21 }
  0x16   :  { %27 = vst [vmem:[#allocation5] sm:$0xff] %v25_v2  ;;  %28 = vst [vmem:[#allocation5 + $0x8] sm:$0xff] %v26_v3  ;;  %p73_p8 = scmp.ne.s32.totalorder %s35_s21, %s72_s22  ;;  %p78_p10 = scmp.lt.s32.totalorder %s72_s22, %s72_s22 }
  0x18   :  { %p79_p11 = por %p78_p10, %p77_p9 }
  0x1a   :  { %p80_p12 = pnand %p79_p11, %p73_p8 }
  0x1c   :  { %83 = shalt.err (!%p80_p12)
}
  0x1d   :  { %s84_s24 = scalar_lea.hbm %s137_s1, 256 }
  0x1e   :  { %p85_p13 = scmp.ne.s32.totalorder %s137_s1, %s84_s24  ;;  %p88_p0 = scmp.lt.u32.totalorder %s84_s24, %s137_s1 }
  0x20   :  { %p90_p1 = pnand %p88_p0, %p85_p13 }
  0x22   :  { %93 = shalt.err (!%p90_p1)
}
  0x23   :  { %40 = dma.vmem_to_hbm [thread:$0]  %s35_s21, 256, %s137_s1, [#allocation4], %s99_s16, %s99_s16, %s100_s17  }
  0x24   :  { %96 = dma.done.wait [#allocation4], 256  }
  0x25   :  { %97 = vsyncadd [#allocation4], 4294967040 }
  0x26   :  { %44 = vsyncpa [#allocation3], 1 }
  0x27   :  { %45 = vsyncpa [#allocation4], 1 }

</bundles_post_ra>
